<compile_context>
chip_gen: v7x
topology: tpu7x:2x2x1
jax: 0.10.0
libtpu: 0.0.40
codegen_flags: <defaults>
</compile_context>

<pallas_src>
import functools
import math

import jax
import jax.numpy as jnp
from jax.experimental import pallas as pl
from jax.experimental.pallas import tpu as pltpu

LN_EPS = 1e-12  # HuggingFace BertModel LayerNorm eps


@functools.lru_cache(maxsize=None)
def _vmem_limit_bytes():
    """Per-generation scoped-VMEM budget: ~85% of physical, capped at 100 MiB
    (v5e/v6e have 128 MiB, v7x has 64 MiB/TC -> ~54 MiB).  Safe 48 MiB fallback."""
    try:
        cap = pltpu.get_tpu_info().vmem_capacity_bytes
        return int(min(cap * 0.85, 100 * 1024 * 1024))
    except Exception:
        return 48 * 1024 * 1024


def _choose_tile(dim, target, align):
    """Largest divisor of `dim` that is <= target and a multiple of `align`;
    falls back to the full dim (a whole-dim block is always legal)."""
    if dim <= target:
        return dim
    t = (target // align) * align
    while t >= align:
        if dim % t == 0:
            return t
        t -= align
    return dim


# ------------------------------ linear kernel -------------------------------

def _linear_kernel(x_ref, w_ref, b_ref, o_ref, acc_ref, *, activation):
    @pl.when(pl.program_id(2) == 0)
    def _():
        acc_ref[...] = jnp.zeros_like(acc_ref)

    # bf16 HBM operands straight into the MXU, f32 accumulation (no per-tile casts).
    acc_ref[...] += jnp.dot(x_ref[...], w_ref[...],
                            preferred_element_type=jnp.float32)

    @pl.when(pl.program_id(2) == pl.num_programs(2) - 1)
    def _():
        out = acc_ref[...] + b_ref[...]
        if activation == "gelu":
            # tanh-approximate GELU (HF BERT uses erf-GELU; diff < 1e-3)
            out = 0.5 * out * (1.0 + jnp.tanh(
                0.7978845608028654 * (out + 0.044715 * out * out * out)))
        o_ref[...] = out.astype(o_ref.dtype)


def linear(x, w, b, activation=None):
    """x:(M,K) bf16 @ w:(K,N) bf16 + b:(N,) f32 (+ gelu) -> (M,N) bf16."""
    M, K = x.shape
    N = w.shape[1]
    tm = _choose_tile(M, 512, 8)      # larger tiles: weight blocks re-DMA'd M/tm times
    tk = _choose_tile(K, 512, 128)
    tn = _choose_tile(N, 512, 128)
    grid = (M // tm, N // tn, K // tk)
    return pl.pallas_call(
        functools.partial(_linear_kernel, activation=activation),
        out_shape=jax.ShapeDtypeStruct((M, N), jnp.bfloat16),
        grid=grid,
        in_specs=[
            pl.BlockSpec((tm, tk), lambda i, j, k: (i, k)),
            pl.BlockSpec((tk, tn), lambda i, j, k: (k, j)),
            pl.BlockSpec((1, tn), lambda i, j, k: (0, j)),
        ],
        out_specs=pl.BlockSpec((tm, tn), lambda i, j, k: (i, j)),
        scratch_shapes=[pltpu.VMEM((tm, tn), jnp.float32)],
        compiler_params=pltpu.CompilerParams(
            dimension_semantics=("parallel", "parallel", "arbitrary"),
            vmem_limit_bytes=_vmem_limit_bytes(),
        ),
    )(x, w, b.reshape(1, N))


# ---------------------------- layer-norm kernels -----------------------------

def _ln_body(x, g_ref, b_ref, o_ref):
    # f32 statistics regardless of input dtype; bf16 output.
    mean = jnp.mean(x, axis=-1, keepdims=True)
    var = jnp.mean(jnp.square(x - mean), axis=-1, keepdims=True)
    y = (x - mean) * jax.lax.rsqrt(var + LN_EPS)
    o_ref[...] = (y * g_ref[...] + b_ref[...]).astype(o_ref.dtype)


def _ln_kernel(x_ref, g_ref, b_ref, o_ref):
    _ln_body(x_ref[...].astype(jnp.float32), g_ref, b_ref, o_ref)


def _res_ln_kernel(x_ref, r_ref, g_ref, b_ref, o_ref):
    # fused residual add + LayerNorm (saves a separate HBM round trip)
    _ln_body(x_ref[...].astype(jnp.float32) + r_ref[...].astype(jnp.float32),
             g_ref, b_ref, o_ref)


def layernorm(x, gamma, beta, residual=None):
    """Row-wise LayerNorm over hidden axis, row-tiled; optional fused residual."""
    M, H = x.shape
    tm = _choose_tile(M, 512, 8)
    grid = (M // tm,)
    row_spec = pl.BlockSpec((tm, H), lambda i: (i, 0))
    vec_spec = pl.BlockSpec((1, H), lambda i: (0, 0))
    if residual is None:
        kernel = _ln_kernel
        inputs = (x, gamma.reshape(1, H), beta.reshape(1, H))
        in_specs = [row_spec, vec_spec, vec_spec]
    else:
        kernel = _res_ln_kernel
        inputs = (x, residual, gamma.reshape(1, H), beta.reshape(1, H))
        in_specs = [row_spec, row_spec, vec_spec, vec_spec]
    return pl.pallas_call(
        kernel,
        out_shape=jax.ShapeDtypeStruct((M, H), jnp.bfloat16),
        grid=grid,
        in_specs=in_specs,
        out_specs=row_spec,
        compiler_params=pltpu.CompilerParams(
            dimension_semantics=("parallel",),
            vmem_limit_bytes=_vmem_limit_bytes(),
        ),
    )(*inputs)


# ----------------------------- attention kernel ------------------------------

def _attn_heads_per_step(num_heads, head_dim):
    """Smallest head batch hb dividing num_heads with hb*head_dim lane-aligned (128).
    Smallest hb also maximizes head groups -> keeps >=2 parallel grid steps."""
    for hb in range(1, num_heads + 1):
        if num_heads % hb == 0 and (hb * head_dim) % 128 == 0:
            return hb
    # TODO(synk): fall back to a padded-head layout when hb*Dh can't hit a 128 lane multiple.
    raise NotImplementedError(
        f"no head batching with num_heads={num_heads}, head_dim={head_dim} "
        "gives a 128-aligned column block")


def _attention_kernel(q_ref, k_ref, v_ref, m_ref, o_ref, *, hb, head_dim):
    # One (batch, head-group) pair per grid step.
    # q/k/v refs: (S, hb*Dh) bf16 column blocks of the fused (B*S, 3H) qkv tensor;
    # softmax scale already folded into the Q projection weights.
    mask = m_ref[...]                                    # (1, S) additive, f32
    for h in range(hb):                                  # static unroll over batched heads
        sl = slice(h * head_dim, (h + 1) * head_dim)
        q = q_ref[:, sl]                                 # (S, Dh) bf16
        k = k_ref[:, sl]
        v = v_ref[:, sl]
        # q @ k^T via dot_general (no in-kernel transpose), f32 accumulation
        s = jax.lax.dot_general(q, k, (((1,), (1,)), ((), ())),
                                preferred_element_type=jnp.float32)       # (S, S)
        s = s + mask
        s = s - jnp.max(s, axis=-1, keepdims=True)
        p = jnp.exp(s)
        denom = jnp.sum(p, axis=-1, keepdims=True)                        # (S, 1)
        ctx = jnp.dot(p.astype(jnp.bfloat16), v,
                      preferred_element_type=jnp.float32)                 # (S, Dh)
        # normalize AFTER P@V (S*Dh multiplies instead of S*S); reciprocal on EUP slot
        o_ref[:, sl] = (ctx * pl.reciprocal(denom, approx=True)).astype(o_ref.dtype)


def attention(qkv, mask_add, num_heads, head_dim):
    """qkv:(B*S, 3H) bf16 (Q pre-scaled); mask_add:(B,S) additive -> ctx (B*S, H) bf16.

    Reads Q/K/V directly from the fused projection layout and writes the context
    directly in (B*S, H) layout: no XLA reshape/transpose round trips.
    """
    B, S = mask_add.shape
    H = num_heads * head_dim
    assert qkv.shape == (B * S, 3 * H)
    hb = _attn_heads_per_step(num_heads, head_dim)
    G = num_heads // hb                      # head groups per batch
    col_w = hb * head_dim                    # column block width (multiple of 128)

    qkv_block = lambda off: pl.BlockSpec((S, col_w), lambda b, g, off=off: (b, off + g))
    return pl.pallas_call(
        functools.partial(_attention_kernel, hb=hb, head_dim=head_dim),
        out_shape=jax.ShapeDtypeStruct((B * S, H), jnp.bfloat16),
        grid=(B, G),
        in_specs=[
            qkv_block(0),          # Q columns   [g*col_w : ...]
            qkv_block(G),          # K columns   [H + g*col_w : ...]
            qkv_block(2 * G),      # V columns   [2H + g*col_w : ...]
            pl.BlockSpec((1, S), lambda b, g: (b, 0)),
        ],
        out_specs=pl.BlockSpec((S, col_w), lambda b, g: (b, g)),
        compiler_params=pltpu.CompilerParams(
            dimension_semantics=("parallel", "parallel"),
            vmem_limit_bytes=_vmem_limit_bytes(),
        ),
    )(qkv, qkv, qkv, mask_add)
    # TODO(synk): add a KV tile axis with online softmax (flash-style) so VMEM use is
    # independent of S (needed on v7x for long sequences).


# ------------------------ parameter init (synthetic) ------------------------

def init_params(key, cfg):
    H, I, V, P, C = (cfg["hidden_size"], cfg["intermediate_size"],
                     cfg["vocab_size"], cfg["max_position"], cfg["num_classes"])
    nH = cfg["num_heads"]
    Dh = H // nH
    scale = 1.0 / math.sqrt(Dh)

    def nrm(k, shape, s=0.02):
        return s * jax.random.normal(k, shape, dtype=jnp.float32)

    keys = iter(jax.random.split(key, 8 + 8 * cfg["num_layers"]))
    params = {
        "word_emb": nrm(next(keys), (V, H)),
        "pos_emb": nrm(next(keys), (P, H)),
        "type_emb": nrm(next(keys), (2, H)),
        "emb_ln_g": jnp.ones((H,), jnp.float32),
        "emb_ln_b": jnp.zeros((H,), jnp.float32),
        "fc_w": nrm(next(keys), (H, C)),
        "fc_b": jnp.zeros((C,), jnp.float32),
        "layers": [],
    }
    for _ in range(cfg["num_layers"]):
        # fused QKV projection [Wq | Wk | Wv] with the 1/sqrt(Dh) softmax scale folded
        # into the Q columns once, here; weights stored bf16 in HBM.
        qw = nrm(next(keys), (H, H)) * scale
        kw = nrm(next(keys), (H, H))
        vw = nrm(next(keys), (H, H))
        qkv_b = jnp.zeros((3 * H,), jnp.float32).at[:H].multiply(scale)
        layer = {
            "qkv_w": jnp.concatenate([qw, kw, vw], axis=1).astype(jnp.bfloat16),
            "qkv_b": qkv_b,
            "ao_w": nrm(next(keys), (H, H)).astype(jnp.bfloat16),
            "ao_b": jnp.zeros((H,), jnp.float32),
            "a_ln_g": jnp.ones((H,), jnp.float32),
            "a_ln_b": jnp.zeros((H,), jnp.float32),
            "i_w": nrm(next(keys), (H, I)).astype(jnp.bfloat16),
            "i_b": jnp.zeros((I,), jnp.float32),
            "o_w": nrm(next(keys), (I, H)).astype(jnp.bfloat16),
            "o_b": jnp.zeros((H,), jnp.float32),
            "o_ln_g": jnp.ones((H,), jnp.float32),
            "o_ln_b": jnp.zeros((H,), jnp.float32),
        }
        params["layers"].append(layer)
    return params


# ------------------------------ model forward -------------------------------

def model_forward(params, x, cfg):
    """Mirrors Model.forward: x = (input_ids, seq_len, attention_mask)."""
    input_ids, seq_len, attention_mask = x   # seq_len unused (as in the PyTorch module)
    del seq_len
    B, S = input_ids.shape
    H, nH = cfg["hidden_size"], cfg["num_heads"]
    Dh = H // nH

    # Embeddings (gather kept in plain JAX glue) + LayerNorm kernel.
    # TODO(synk): token_type_ids hard-coded to 0 (matches all-zero segment ids).
    pos_ids = jnp.arange(S)
    emb = (params["word_emb"][input_ids]
           + params["pos_emb"][pos_ids][None, :, :]
           + params["type_emb"][0][None, None, :])
    hidden = layernorm(emb.reshape(B * S, H),
                       params["emb_ln_g"], params["emb_ln_b"])        # (B*S, H) bf16

    # Additive attention mask precomputed once: (1 - mask) * -10000
    mask_add = (1.0 - attention_mask.astype(jnp.float32)) * (-10000.0)   # (B, S)

    for layer in params["layers"]:
        x2 = hidden                                            # (B*S, H) bf16
        qkv = linear(x2, layer["qkv_w"], layer["qkv_b"])       # (B*S, 3H) bf16, Q pre-scaled
        ctx = attention(qkv, mask_add, nH, Dh)                 # (B*S, H)  bf16
        attn_out = linear(ctx, layer["ao_w"], layer["ao_b"])
        hidden2 = layernorm(attn_out, layer["a_ln_g"], layer["a_ln_b"], residual=x2)
        inter = linear(hidden2, layer["i_w"], layer["i_b"], activation="gelu")
        ffn_out = linear(inter, layer["o_w"], layer["o_b"])
        hidden = layernorm(ffn_out, layer["o_ln_g"], layer["o_ln_b"], residual=hidden2)

    hidden = hidden.reshape(B, S, H)
    cls_representation = hidden[:, 0, :].astype(jnp.float32)          # (B, H)
    # Tiny (B, num_classes) projection: plain XLA matmul (kernel launch + masked
    # partial stores would dominate the ~B*H*C FLOPs).
    logits = jnp.dot(cls_representation, params["fc_w"]) + params["fc_b"]
    return logits                                                     # (B, num_classes)


# ------------------------------------ main -----------------------------------

if __name__ == "__main__":
    # Small but lane-friendly BERT-ish config: H=128, 2 heads -> Dh=64 (2 heads
    # batched per attention grid step -> 128-wide column blocks).
    cfg = dict(vocab_size=100, hidden_size=128, num_heads=2, num_layers=2,
               intermediate_size=256, max_position=16, num_classes=3)
    B, S = 2, 8

    key = jax.random.PRNGKey(0)
    k_param, k_ids = jax.random.split(key)
    params = init_params(k_param, cfg)

    input_ids = jax.random.randint(k_ids, (B, S), 0, cfg["vocab_size"], dtype=jnp.int32)
    # second example has only 6 valid tokens -> exercises masking
    attention_mask = jnp.array([[1, 1, 1, 1, 1, 1, 1, 1],
                                [1, 1, 1, 1, 1, 1, 0, 0]], dtype=jnp.int32)
    seq_len = attention_mask.sum(axis=-1)   # present in the tuple, unused (matches PyTorch)

    # TODO(synk): pretrained ERNIE weights are replaced by deterministic random init.
    logits = model_forward(params, (input_ids, seq_len, attention_mask), cfg)
    jax.block_until_ready(logits)
    assert logits.shape == (B, cfg["num_classes"])
    print("KERNEL_OK")
</pallas_src>

<mosaic_0001>
module attributes {stable_mosaic.version = 11 : i64} {
  func.func @_ln_kernel(%arg0: i32, %arg1: memref<16x128xf32, #tpu.memory_space<vmem>>, %arg2: memref<1x128xf32, #tpu.memory_space<vmem>>, %arg3: memref<1x128xf32, #tpu.memory_space<vmem>>, %arg4: memref<16x128xbf16, #tpu.memory_space<vmem>>) attributes {dimension_semantics = [#tpu.dimension_semantics<parallel>], iteration_bounds = array<i64: 1>, scalar_prefetch = 0 : i64, scratch_operands = 0 : i64, tpu.core_type = #tpu.core_type<tc>, window_params = [{transform_indices = @transform_0, window_bounds = array<i64: 16, 128>}, {pipeline_mode = #tpu.pipeline_mode<synchronous>, transform_indices = @transform_1, window_bounds = array<i64: 1, 128>}, {pipeline_mode = #tpu.pipeline_mode<synchronous>, transform_indices = @transform_2, window_bounds = array<i64: 1, 128>}, {transform_indices = @transform_3, window_bounds = array<i64: 16, 128>}]} {
    %c0 = arith.constant 0 : index
    %c0_0 = arith.constant 0 : index
    %0 = vector.load %arg1[%c0, %c0_0] : memref<16x128xf32, #tpu.memory_space<vmem>>, vector<16x128xf32>
    %cst = arith.constant dense<0.000000e+00> : vector<16xf32>
    %1 = vector.multi_reduction <add>, %0, %cst [1] : vector<16x128xf32> to vector<16xf32>
    %2 = vector.shape_cast %1 : vector<16xf32> to vector<16x1xf32>
    %cst_1 = arith.constant 1.280000e+02 : f32
    %3 = vector.broadcast %cst_1 : f32 to vector<16x1xf32>
    %4 = arith.divf %2, %3 : vector<16x1xf32>
    %5 = vector.broadcast %4 : vector<16x1xf32> to vector<16x128xf32>
    %6 = arith.subf %0, %5 : vector<16x128xf32>
    %7 = arith.mulf %6, %6 : vector<16x128xf32>
    %cst_2 = arith.constant dense<0.000000e+00> : vector<16xf32>
    %8 = vector.multi_reduction <add>, %7, %cst_2 [1] : vector<16x128xf32> to vector<16xf32>
    %9 = vector.shape_cast %8 : vector<16xf32> to vector<16x1xf32>
    %cst_3 = arith.constant 1.280000e+02 : f32
    %10 = vector.broadcast %cst_3 : f32 to vector<16x1xf32>
    %11 = arith.divf %9, %10 : vector<16x1xf32>
    %12 = vector.broadcast %4 : vector<16x1xf32> to vector<16x128xf32>
    %13 = arith.subf %0, %12 : vector<16x128xf32>
    %cst_4 = arith.constant 9.99999996E-13 : f32
    %14 = vector.broadcast %cst_4 : f32 to vector<16x1xf32>
    %15 = arith.addf %11, %14 : vector<16x1xf32>
    %16 = math.rsqrt %15 : vector<16x1xf32>
    %17 = vector.broadcast %16 : vector<16x1xf32> to vector<16x128xf32>
    %18 = arith.mulf %13, %17 : vector<16x128xf32>
    %c0_5 = arith.constant 0 : index
    %c0_6 = arith.constant 0 : index
    %19 = vector.load %arg2[%c0_5, %c0_6] : memref<1x128xf32, #tpu.memory_space<vmem>>, vector<1x128xf32>
    %20 = vector.broadcast %19 : vector<1x128xf32> to vector<16x128xf32>
    %21 = arith.mulf %18, %20 : vector<16x128xf32>
    %c0_7 = arith.constant 0 : index
    %c0_8 = arith.constant 0 : index
    %22 = vector.load %arg3[%c0_7, %c0_8] : memref<1x128xf32, #tpu.memory_space<vmem>>, vector<1x128xf32>
    %23 = vector.broadcast %22 : vector<1x128xf32> to vector<16x128xf32>
    %24 = arith.addf %21, %23 : vector<16x128xf32>
    %25 = arith.truncf %24 : vector<16x128xf32> to vector<16x128xbf16>
    %c0_9 = arith.constant 0 : index
    %c0_10 = arith.constant 0 : index
    %26 = vector.load %arg4[%c0_9, %c0_10] : memref<16x128xbf16, #tpu.memory_space<vmem>>, vector<16x128xbf16>
    tpu.vector_store %arg4[%c0_9, %c0_10], %25 {strides = array<i32>} : memref<16x128xbf16, #tpu.memory_space<vmem>>, vector<16x128xbf16>,
    return
  }
  func.func @transform_0(%arg0: i32) -> (i32, i32) {
    %c0_i32 = arith.constant 0 : i32
    %c0_i32_0 = arith.constant 0 : i32
    return %arg0, %c0_i32 : i32, i32
  }
  func.func @transform_1(%arg0: i32) -> (i32, i32) {
    %c0_i32 = arith.constant 0 : i32
    %c0_i32_0 = arith.constant 0 : i32
    %c0_i32_1 = arith.constant 0 : i32
    return %c0_i32, %c0_i32_0 : i32, i32
  }
  func.func @transform_2(%arg0: i32) -> (i32, i32) {
    %c0_i32 = arith.constant 0 : i32
    %c0_i32_0 = arith.constant 0 : i32
    %c0_i32_1 = arith.constant 0 : i32
    return %c0_i32, %c0_i32_0 : i32, i32
  }
  func.func @transform_3(%arg0: i32) -> (i32, i32) {
    %c0_i32 = arith.constant 0 : i32
    %c0_i32_0 = arith.constant 0 : i32
    return %arg0, %c0_i32 : i32, i32
  }
}

</mosaic_0001>

<bundles_post_ra>
// kernel: tpu_custom_call.1
= control target key start
LH: loop header
LB: loop body
LE: loop exit
PB: predicated region body
PF: predicated region fallthrough
CT: control target
= control target key end

     0   :  { %8 = vsyncpa [#allocation3], 0  ;;  %s224_s0 = inlined_call_operand.hbm [shape: f32[16,128], index: 0, kind: input, shape index: {}]   ;;  %s225_s1 = inlined_call_operand.vmem [shape: f32[1,128], index: 1, kind: input, shape index: {}]   ;;  %s226_s2 = inlined_call_operand.vmem [shape: f32[1,128], index: 2, kind: input, shape index: {}]   ;;  %s227_s3 = inlined_call_operand.hbm [shape: bf16[16,128], index: 3, kind: output, shape index: {}]  }
   0x1   :  { %9 = vsyncpa [#allocation4], 0  ;;  %s168_s12 = smov [#allocation2]   ;;  %s120_s16 = scalar_lea.hbm %s224_s0, 256 }
   0x2   :  { %s15_s13 = sshll.u32 %s168_s12, 4  ;;  %p121_p0 = scmp.ne.s32.totalorder %s224_s0, %s120_s16  ;;  %s16_s13 = int_to_ptr.vmem [resolvable:$true] %s15_s13 }
   0x3   :  { %p124_p1 = scmp.lt.u32.totalorder %s120_s16, %s224_s0 }
   0x5   :  { %p126_p2 = pnand %p124_p1, %p121_p0 }
   0x7   :  { %129 = shalt.err (!%p126_p2)
}
   0x8   :  { %s130_s21 = scalar_lea.vmem %s16_s13, 256  ;;  %p135_p4 = scmp.lt.s32.totalorder %s16_s13, %s16_s13 }
   0x9   :  { %p131_p3 = scmp.ne.s32.totalorder %s16_s13, %s130_s21  ;;  %p136_p5 = scmp.lt.s32.totalorder %s130_s21, %s130_s21 }
   0xb   :  { %p137_p6 = por %p136_p5, %p135_p4 }
   0xd   :  { %p138_p7 = pnand %p137_p6, %p131_p3 }
   0xf   :  { %141 = shalt.err (!%p138_p7)
}
  0x10   :  { %s169_s22 = smov 128   ;;  %s170_s23 = smov 8  }
  0x11   :  { %21 = dma.hbm_to_vmem [thread:$0]  %s224_s0, 256, %s16_s13, [#allocation3], %s169_s22, %s169_s22, %s170_s23  }
  0x12   :  { %164 = dma.done.wait [#allocation3], 256  }
  0x13   :  { %165 = vsyncadd [#allocation3], 4294967040  ;;  %v29_v0 = vld [vmem:[#allocation2] sm:$0xff]  ;;  %v30_v1 = vld [vmem:[#allocation2 + $0x8] sm:$0xff]  ;;  %s171_s29 = smov [#allocation5]  }
  0x14   :  { %31 = vadd.xlane.f32.xlu0 %v29_v0  ;;  %v99_v18 = vld [vmem:[%s225_s1] ss:$0 sm:$0xff]  ;;  %s87_s30 = sshll.u32 %s171_s29, 4  ;;  %s88_s30 = int_to_ptr.vmem [resolvable:$true] %s87_s30 }
  0x15   :  { %v100_v22 = vld [vmem:[%s226_s2] ss:$0 sm:$0xff]  ;;  %s142_s4 = scalar_lea.vmem %s88_s30, 128  ;;  %p147_p9 = scmp.lt.s32.totalorder %s88_s30, %s88_s30 }
  0x16   :  { %p143_p8 = scmp.ne.s32.totalorder %s88_s30, %s142_s4  ;;  %p148_p10 = scmp.lt.s32.totalorder %s142_s4, %s142_s4 }
  0x18   :  { %33 = vadd.xlane.f32.xlu0 %v30_v1  ;;  %p149_p11 = por %p148_p10, %p147_p9 }
  0x1a   :  { %p150_p12 = pnand %p149_p11, %p143_p8 }
  0xa1   :  { %v32_v2 = vpop.xlane.xlu0 %31 }
  0xa2   :  { %v36_v3 = vmul.f32 0.0078125, %v32_v2 }
  0xa4   :  { %v38_v4 = vsub.f32 %v29_v0, %v36_v3 }
  0xa5   :  { %v34_v5 = vpop.xlane.xlu0 %33 }
  0xa6   :  { %v37_v6 = vmul.f32 0.0078125, %v34_v5  ;;  %v40_v7 = vmul.f32 %v38_v4, %v38_v4 }
  0xa8   :  { %v39_v8 = vsub.f32 %v30_v1, %v37_v6  ;;  %42 = vadd.xlane.f32.xlu1 %v40_v7 }
  0xaa   :  { %v41_v9 = vmul.f32 %v39_v8, %v39_v8 }
  0xac   :  { %44 = vadd.xlane.f32.xlu1 %v41_v9 }
 0x135   :  { %v43_v10 = vpop.xlane.xlu1 %42 }
 0x136   :  { %v46_v11 = vmul.f32 0.0078125, %v43_v10 }
 0x138   :  { %v48_v12 = vadd.f32 1e-12, %v46_v11 }
 0x139   :  { %v45_v13 = vpop.xlane.xlu1 %44 }
 0x13a   :  { %116 = vrsqrt.f32 %v48_v12  ;;  %v47_v14 = vmul.f32 0.0078125, %v45_v13 }
 0x13c   :  { %v49_v15 = vadd.f32 1e-12, %v47_v14 }
 0x13e   :  { %118 = vrsqrt.f32 %v49_v15 }
 0x144   :  { %v117_v16 = vpop.eup %116 }
 0x145   :  { %v52_v17 = vmul.f32 %v117_v16, %v38_v4 }
 0x147   :  { %v61_v21 = vmul.f32 %v99_v18, %v52_v17 }
 0x148   :  { %v119_v19 = vpop.eup %118 }
 0x149   :  { %v53_v20 = vmul.f32 %v119_v19, %v39_v8  ;;  %v70_v24 = vadd.f32 %v100_v22, %v61_v21 }
 0x14b   :  { %v62_v23 = vmul.f32 %v99_v18, %v53_v20 }
 0x14d   :  { %v71_v25 = vadd.f32 %v100_v22, %v62_v23 }
 0x14f   :  { %v108_v26 = vpack.c.bf16 %v71_v25, %v70_v24 }
 0x151   :  { %109 = vst [vmem:[#allocation5] sm:$0xff] %v108_v26  }
 0x152   :  { %153 = shalt.err (!%p150_p12)
}
 0x153   :  { %s154_s6 = scalar_lea.hbm %s227_s3, 128 }
 0x154   :  { %p155_p13 = scmp.ne.s32.totalorder %s227_s3, %s154_s6  ;;  %p158_p0 = scmp.lt.u32.totalorder %s154_s6, %s227_s3 }
 0x156   :  { %p160_p1 = pnand %p158_p0, %p155_p13 }
 0x158   :  { %163 = shalt.err (!%p160_p1)
}
 0x159   :  { %s172_s10 = smov 64   ;;  %s173_s11 = smov 4  }
 0x15a   :  { %93 = dma.vmem_to_hbm [thread:$0]  %s88_s30, 128, %s227_s3, [#allocation4], %s172_s10, %s172_s10, %s173_s11  }
 0x15b   :  { %166 = dma.done.wait [#allocation4], 128  }
 0x15c   :  { %167 = vsyncadd [#allocation4], 4294967168 }
 0x15d   :  { %97 = vsyncpa [#allocation3], 1 }
 0x15e   :  { %98 = vsyncpa [#allocation4], 1 }

</bundles_post_ra>
